<compile_context>
chip_gen: v6e
topology: v6e:2x2x1
jax: 0.10.0
libtpu: 0.0.40
codegen_flags: <defaults>
</compile_context>

<pallas_src>
import functools

import jax
import jax.numpy as jnp
from jax.experimental import pallas as pl
from jax.experimental.pallas import tpu as pltpu

# --- module hyper-parameters (deterministic, as in the PyTorch __init__) ----
BINS = 32
MIN_BIN_EDGE = -1.0
MAX_BIN_EDGE = 1.0
SIGMA = 50.0
DELTA = float(MAX_BIN_EDGE - MIN_BIN_EDGE) / float(BINS)

# data tiling
TILE_COLS = 128          # lane width
MAX_TILE_ROWS = 1024     # 1024x128 f32 = 512 KiB / block (1 MiB double-buffered)

# padding value far outside [min, max]: tanh saturates to exactly 1.0 at every
# edge -> adjacent differences are exactly 0 -> zero contribution.
# (0.5*sigma*1e30 ~ 2.5e31 << f32 max, so no overflow after scaling.)
PAD_VALUE = 1e30


def _round_up(v, m):
    return ((v + m - 1) // m) * m


def _soft_histogram_kernel(x_ref, o_ref, acc_ref, *, half_sigma, scaled_edges,
                           bins):
    """One (tile_rows, 128) data tile; accumulate per-EDGE column sums.

    scaled_edges: tuple of python floats, 0.5*sigma*edge_e, e = 0..bins.
    acc_ref: (edges_pad, 128) f32 VMEM scratch of per-lane per-edge partial sums.
    o_ref:   (bins_pad, 1)   f32 output block (written only on the last step).
    """
    num_edges = bins + 1
    edges_pad, cols = acc_ref.shape
    i = pl.program_id(1)

    @pl.when(i == 0)
    def _():
        acc_ref[...] = jnp.zeros_like(acc_ref)

    # Edge-shared tanh: num_edges lane-dense EUP passes per tile.  The scale is
    # folded into each per-edge op (no full-tile `xs` temp); VALU/vld have slack,
    # EUP is the binding slot.
    partials = []
    for e in range(num_edges):
        t = jnp.tanh(x_ref[...] * half_sigma - scaled_edges[e])   # (T, 128) f32
        partials.append(jnp.sum(t, axis=0, keepdims=True))        # (1, 128)
    if edges_pad > num_edges:
        partials.append(jnp.zeros((edges_pad - num_edges, cols), jnp.float32))

    # Single full-block accumulator update per grid step.
    acc_ref[...] += jnp.concatenate(partials, axis=0)

    # Adjacent-edge differences + cross-lane fold once, at the last step.
    @pl.when(i == pl.num_programs(1) - 1)
    def _():
        acc = acc_ref[...]                                    # (edges_pad, 128)
        diff = acc[0:bins, :] - acc[1:bins + 1, :]            # (bins, 128)
        res = 0.5 * jnp.sum(diff, axis=1, keepdims=True)      # (bins, 1)
        out_rows = o_ref.shape[0]
        if out_rows > bins:
            res = jnp.concatenate(
                [res, jnp.zeros((out_rows - bins, 1), jnp.float32)], axis=0)
        o_ref[...] = res.astype(o_ref.dtype)


def soft_histogram(x, *, bins=BINS, min_bin_edge=MIN_BIN_EDGE,
                   max_bin_edge=MAX_BIN_EDGE, sigma=SIGMA):
    """Differentiable soft histogram matching SoftHistogram.forward.

    x: any shape (flattened internally). Returns (bins,) float32 counts.
    """
    delta = float(max_bin_edge - min_bin_edge) / float(bins)
    num_edges = bins + 1
    edges_pad = _round_up(num_edges, 8)
    bins_pad = _round_up(bins, 8)

    # Bake 0.5*sigma into the edges (tanh formulation).
    half_sigma = 0.5 * float(sigma)
    scaled_edges = tuple(half_sigma * (float(min_bin_edge) + delta * e)
                         for e in range(num_edges))

    x_flat = jnp.ravel(x).astype(jnp.float32)
    n = int(x_flat.shape[0])

    # --- input-sized tiling: pad only to the next 8x128 row granule ----------
    rows_needed = max(1, -(-n // TILE_COLS))
    num_splits = 2 if rows_needed >= 2 * MAX_TILE_ROWS else 1
    rows_per_split = -(-rows_needed // num_splits)
    if rows_per_split <= MAX_TILE_ROWS:
        tile_rows = max(8, _round_up(rows_per_split, 8))
        tiles_per_split = 1
    else:
        tile_rows = MAX_TILE_ROWS
        tiles_per_split = -(-rows_per_split // tile_rows)
    total = num_splits * tiles_per_split * tile_rows * TILE_COLS

    n_pad = total - n
    if n_pad:
        x_flat = jnp.concatenate(
            [x_flat, jnp.full((n_pad,), PAD_VALUE, dtype=jnp.float32)])
    x2d = x_flat.reshape(total // TILE_COLS, TILE_COLS)

    kernel = functools.partial(
        _soft_histogram_kernel, half_sigma=half_sigma,
        scaled_edges=scaled_edges, bins=bins)

    cost = pl.CostEstimate(
        flops=total * 3 * num_edges,
        transcendentals=total * num_edges,
        bytes_accessed=total * 4 + num_splits * bins_pad * 4,
    )

    out = pl.pallas_call(
        kernel,
        out_shape=jax.ShapeDtypeStruct((num_splits * bins_pad, 1), jnp.float32),
        grid_spec=pltpu.PrefetchScalarGridSpec(
            num_scalar_prefetch=0,
            grid=(num_splits, tiles_per_split),
            in_specs=[
                pl.BlockSpec(
                    (tile_rows, TILE_COLS),
                    lambda s, i: (s * tiles_per_split + i, 0),
                ),
            ],
            out_specs=pl.BlockSpec((bins_pad, 1), lambda s, i: (s, 0)),
            scratch_shapes=[pltpu.VMEM((edges_pad, TILE_COLS), jnp.float32)],
        ),
        compiler_params=pltpu.CompilerParams(
            dimension_semantics=("parallel", "arbitrary"),
        ),
        cost_estimate=cost,
    )(x2d)

    # Combine per-split partial histograms and drop padded bins.
    out = out.reshape(num_splits, bins_pad).sum(axis=0)
    return out[:bins]


def soft_histogram_reference(x, centers, *, sigma=SIGMA, delta=DELTA):
    """Pure-JAX reference mirroring the PyTorch forward exactly."""
    xf = jnp.ravel(x).astype(jnp.float32)
    d = xf[None, :] - centers[:, None]                      # (bins, N)
    h = jax.nn.sigmoid(sigma * (d + delta / 2.0)) - jax.nn.sigmoid(
        sigma * (d - delta / 2.0))
    return jnp.sum(h, axis=1)                               # (bins,)


if __name__ == "__main__":
    # Deterministic parameters (as in __init__): bin centers for the reference.
    centers = MIN_BIN_EDGE + DELTA * (jnp.arange(BINS, dtype=jnp.float32) + 0.5)

    # Small example input consistent with usage (image-like tensor, flattened):
    # (2, 4, 16, 16) -> 2048 elements.
    key = jax.random.PRNGKey(0)
    x = jax.random.uniform(
        key, (2, 4, 16, 16), dtype=jnp.float32, minval=-1.0, maxval=1.0)

    out = soft_histogram(x)
    out = jax.block_until_ready(out)

    ref = soft_histogram_reference(x, centers)
    assert out.shape == (BINS,)
    assert jnp.allclose(out, ref, rtol=1e-4, atol=1e-3), (out, ref)

    print("KERNEL_OK")
</pallas_src>

<mosaic_0001>
module attributes {stable_mosaic.version = 11 : i64} {
  func.func @_soft_histogram_kernel(%arg0: i32, %arg1: i32, %arg2: memref<16x128xf32, #tpu.memory_space<vmem>>, %arg3: memref<32x1xf32, #tpu.memory_space<vmem>>, %arg4: memref<40x128xf32, #tpu.memory_space<vmem>>) attributes {dimension_semantics = [#tpu.dimension_semantics<parallel>, #tpu.dimension_semantics<arbitrary>], iteration_bounds = array<i64: 1, 1>, scalar_prefetch = 0 : i64, scratch_operands = 1 : i64, tpu.core_type = #tpu.core_type<tc>, window_params = [{transform_indices = @transform_0, window_bounds = array<i64: 16, 128>}, {transform_indices = @transform_1, window_bounds = array<i64: 32, 1>}]} {
    %c0_i32 = arith.constant 0 : i32
    %0 = arith.cmpi eq, %arg1, %c0_i32 : i32
    %1 = arith.extui %0 : i1 to i32
    %c0_i32_0 = arith.constant 0 : i32
    %2 = arith.cmpi ne, %1, %c0_i32_0 : i32
    scf.if %2 {
      %cst_171 = arith.constant 0.000000e+00 : f32
      %278 = vector.broadcast %cst_171 : f32 to vector<40x128xf32>
      %c0_172 = arith.constant 0 : index
      %c0_173 = arith.constant 0 : index
      %279 = vector.load %arg4[%c0_172, %c0_173] : memref<40x128xf32, #tpu.memory_space<vmem>>, vector<40x128xf32>
      tpu.vector_store %arg4[%c0_172, %c0_173], %278 {strides = array<i32>} : memref<40x128xf32, #tpu.memory_space<vmem>>, vector<40x128xf32>,
    } else {
    }
    %c0 = arith.constant 0 : index
    %c0_1 = arith.constant 0 : index
    %3 = vector.load %arg2[%c0, %c0_1] : memref<16x128xf32, #tpu.memory_space<vmem>>, vector<16x128xf32>
    %cst = arith.constant 2.500000e+01 : f32
    %4 = vector.broadcast %cst : f32 to vector<16x128xf32>
    %5 = arith.mulf %3, %4 : vector<16x128xf32>
    %cst_2 = arith.constant -2.500000e+01 : f32
    %6 = vector.broadcast %cst_2 : f32 to vector<16x128xf32>
    %7 = arith.subf %5, %6 : vector<16x128xf32>
    %8 = math.tanh %7 : vector<16x128xf32>
    %cst_3 = arith.constant dense<0.000000e+00> : vector<128xf32>
    %9 = vector.multi_reduction <add>, %8, %cst_3 [0] : vector<16x128xf32> to vector<128xf32>
    %10 = vector.shape_cast %9 : vector<128xf32> to vector<1x128xf32>
    %c0_4 = arith.constant 0 : index
    %c0_5 = arith.constant 0 : index
    %11 = vector.load %arg2[%c0_4, %c0_5] : memref<16x128xf32, #tpu.memory_space<vmem>>, vector<16x128xf32>
    %cst_6 = arith.constant 2.500000e+01 : f32
    %12 = vector.broadcast %cst_6 : f32 to vector<16x128xf32>
    %13 = arith.mulf %11, %12 : vector<16x128xf32>
    %cst_7 = arith.constant -2.343750e+01 : f32
    %14 = vector.broadcast %cst_7 : f32 to vector<16x128xf32>
    %15 = arith.subf %13, %14 : vector<16x128xf32>
    %16 = math.tanh %15 : vector<16x128xf32>
    %cst_8 = arith.constant dense<0.000000e+00> : vector<128xf32>
    %17 = vector.multi_reduction <add>, %16, %cst_8 [0] : vector<16x128xf32> to vector<128xf32>
    %18 = vector.shape_cast %17 : vector<128xf32> to vector<1x128xf32>
    %c0_9 = arith.constant 0 : index
    %c0_10 = arith.constant 0 : index
    %19 = vector.load %arg2[%c0_9, %c0_10] : memref<16x128xf32, #tpu.memory_space<vmem>>, vector<16x128xf32>
    %cst_11 = arith.constant 2.500000e+01 : f32
    %20 = vector.broadcast %cst_11 : f32 to vector<16x128xf32>
    %21 = arith.mulf %19, %20 : vector<16x128xf32>
    %cst_12 = arith.constant -2.187500e+01 : f32
    %22 = vector.broadcast %cst_12 : f32 to vector<16x128xf32>
    %23 = arith.subf %21, %22 : vector<16x128xf32>
    %24 = math.tanh %23 : vector<16x128xf32>
    %cst_13 = arith.constant dense<0.000000e+00> : vector<128xf32>
    %25 = vector.multi_reduction <add>, %24, %cst_13 [0] : vector<16x128xf32> to vector<128xf32>
    %26 = vector.shape_cast %25 : vector<128xf32> to vector<1x128xf32>
    %c0_14 = arith.constant 0 : index
    %c0_15 = arith.constant 0 : index
    %27 = vector.load %arg2[%c0_14, %c0_15] : memref<16x128xf32, #tpu.memory_space<vmem>>, vector<16x128xf32>
    %cst_16 = arith.constant 2.500000e+01 : f32
    %28 = vector.broadcast %cst_16 : f32 to vector<16x128xf32>
    %29 = arith.mulf %27, %28 : vector<16x128xf32>
    %cst_17 = arith.constant -2.031250e+01 : f32
    %30 = vector.broadcast %cst_17 : f32 to vector<16x128xf32>
    %31 = arith.subf %29, %30 : vector<16x128xf32>
    %32 = math.tanh %31 : vector<16x128xf32>
    %cst_18 = arith.constant dense<0.000000e+00> : vector<128xf32>
    %33 = vector.multi_reduction <add>, %32, %cst_18 [0] : vector<16x128xf32> to vector<128xf32>
    %34 = vector.shape_cast %33 : vector<128xf32> to vector<1x128xf32>
    %c0_19 = arith.constant 0 : index
    %c0_20 = arith.constant 0 : index
    %35 = vector.load %arg2[%c0_19, %c0_20] : memref<16x128xf32, #tpu.memory_space<vmem>>, vector<16x128xf32>
    %cst_21 = arith.constant 2.500000e+01 : f32
    %36 = vector.broadcast %cst_21 : f32 to vector<16x128xf32>
    %37 = arith.mulf %35, %36 : vector<16x128xf32>
    %cst_22 = arith.constant -1.875000e+01 : f32
    %38 = vector.broadcast %cst_22 : f32 to vector<16x128xf32>
    %39 = arith.subf %37, %38 : vector<16x128xf32>
    %40 = math.tanh %39 : vector<16x128xf32>
    %cst_23 = arith.constant dense<0.000000e+00> : vector<128xf32>
    %41 = vector.multi_reduction <add>, %40, %cst_23 [0] : vector<16x128xf32> to vector<128xf32>
    %42 = vector.shape_cast %41 : vector<128xf32> to vector<1x128xf32>
    %c0_24 = arith.constant 0 : index
    %c0_25 = arith.constant 0 : index
    %43 = vector.load %arg2[%c0_24, %c0_25] : memref<16x128xf32, #tpu.memory_space<vmem>>, vector<16x128xf32>
    %cst_26 = arith.constant 2.500000e+01 : f32
    %44 = vector.broadcast %cst_26 : f32 to vector<16x128xf32>
    %45 = arith.mulf %43, %44 : vector<16x128xf32>
    %cst_27 = arith.constant -1.718750e+01 : f32
    %46 = vector.broadcast %cst_27 : f32 to vector<16x128xf32>
    %47 = arith.subf %45, %46 : vector<16x128xf32>
    %48 = math.tanh %47 : vector<16x128xf32>
    %cst_28 = arith.constant dense<0.000000e+00> : vector<128xf32>
    %49 = vector.multi_reduction <add>, %48, %cst_28 [0] : vector<16x128xf32> to vector<128xf32>
    %50 = vector.shape_cast %49 : vector<128xf32> to vector<1x128xf32>
    %c0_29 = arith.constant 0 : index
    %c0_30 = arith.constant 0 : index
    %51 = vector.load %arg2[%c0_29, %c0_30] : memref<16x128xf32, #tpu.memory_space<vmem>>, vector<16x128xf32>
    %cst_31 = arith.constant 2.500000e+01 : f32
    %52 = vector.broadcast %cst_31 : f32 to vector<16x128xf32>
    %53 = arith.mulf %51, %52 : vector<16x128xf32>
    %cst_32 = arith.constant -1.562500e+01 : f32
    %54 = vector.broadcast %cst_32 : f32 to vector<16x128xf32>
    %55 = arith.subf %53, %54 : vector<16x128xf32>
    %56 = math.tanh %55 : vector<16x128xf32>
    %cst_33 = arith.constant dense<0.000000e+00> : vector<128xf32>
    %57 = vector.multi_reduction <add>, %56, %cst_33 [0] : vector<16x128xf32> to vector<128xf32>
    %58 = vector.shape_cast %57 : vector<128xf32> to vector<1x128xf32>
    %c0_34 = arith.constant 0 : index
    %c0_35 = arith.constant 0 : index
    %59 = vector.load %arg2[%c0_34, %c0_35] : memref<16x128xf32, #tpu.memory_space<vmem>>, vector<16x128xf32>
    %cst_36 = arith.constant 2.500000e+01 : f32
    %60 = vector.broadcast %cst_36 : f32 to vector<16x128xf32>
    %61 = arith.mulf %59, %60 : vector<16x128xf32>
    %cst_37 = arith.constant -1.406250e+01 : f32
    %62 = vector.broadcast %cst_37 : f32 to vector<16x128xf32>
    %63 = arith.subf %61, %62 : vector<16x128xf32>
    %64 = math.tanh %63 : vector<16x128xf32>
    %cst_38 = arith.constant dense<0.000000e+00> : vector<128xf32>
    %65 = vector.multi_reduction <add>, %64, %cst_38 [0] : vector<16x128xf32> to vector<128xf32>
    %66 = vector.shape_cast %65 : vector<128xf32> to vector<1x128xf32>
    %c0_39 = arith.constant 0 : index
    %c0_40 = arith.constant 0 : index
    %67 = vector.load %arg2[%c0_39, %c0_40] : memref<16x128xf32, #tpu.memory_space<vmem>>, vector<16x128xf32>
    %cst_41 = arith.constant 2.500000e+01 : f32
    %68 = vector.broadcast %cst_41 : f32 to vector<16x128xf32>
    %69 = arith.mulf %67, %68 : vector<16x128xf32>
    %cst_42 = arith.constant -1.250000e+01 : f32
    %70 = vector.broadcast %cst_42 : f32 to vector<16x128xf32>
    %71 = arith.subf %69, %70 : vector<16x128xf32>
    %72 = math.tanh %71 : vector<16x128xf32>
    %cst_43 = arith.constant dense<0.000000e+00> : vector<128xf32>
    %73 = vector.multi_reduction <add>, %72, %cst_43 [0] : vector<16x128xf32> to vector<128xf32>
    %74 = vector.shape_cast %73 : vector<128xf32> to vector<1x128xf32>
    %c0_44 = arith.constant 0 : index
    %c0_45 = arith.constant 0 : index
    %75 = vector.load %arg2[%c0_44, %c0_45] : memref<16x128xf32, #tpu.memory_space<vmem>>, vector<16x128xf32>
    %cst_46 = arith.constant 2.500000e+01 : f32
    %76 = vector.broadcast %cst_46 : f32 to vector<16x128xf32>
    %77 = arith.mulf %75, %76 : vector<16x128xf32>
    %cst_47 = arith.constant -1.093750e+01 : f32
    %78 = vector.broadcast %cst_47 : f32 to vector<16x128xf32>
    %79 = arith.subf %77, %78 : vector<16x128xf32>
    %80 = math.tanh %79 : vector<16x128xf32>
    %cst_48 = arith.constant dense<0.000000e+00> : vector<128xf32>
    %81 = vector.multi_reduction <add>, %80, %cst_48 [0] : vector<16x128xf32> to vector<128xf32>
    %82 = vector.shape_cast %81 : vector<128xf32> to vector<1x128xf32>
    %c0_49 = arith.constant 0 : index
    %c0_50 = arith.constant 0 : index
    %83 = vector.load %arg2[%c0_49, %c0_50] : memref<16x128xf32, #tpu.memory_space<vmem>>, vector<16x128xf32>
    %cst_51 = arith.constant 2.500000e+01 : f32
    %84 = vector.broadcast %cst_51 : f32 to vector<16x128xf32>
    %85 = arith.mulf %83, %84 : vector<16x128xf32>
    %cst_52 = arith.constant -9.375000e+00 : f32
    %86 = vector.broadcast %cst_52 : f32 to vector<16x128xf32>
    %87 = arith.subf %85, %86 : vector<16x128xf32>
    %88 = math.tanh %87 : vector<16x128xf32>
    %cst_53 = arith.constant dense<0.000000e+00> : vector<128xf32>
    %89 = vector.multi_reduction <add>, %88, %cst_53 [0] : vector<16x128xf32> to vector<128xf32>
    %90 = vector.shape_cast %89 : vector<128xf32> to vector<1x128xf32>
    %c0_54 = arith.constant 0 : index
    %c0_55 = arith.constant 0 : index
    %91 = vector.load %arg2[%c0_54, %c0_55] : memref<16x128xf32, #tpu.memory_space<vmem>>, vector<16x128xf32>
    %cst_56 = arith.constant 2.500000e+01 : f32
    %92 = vector.broadcast %cst_56 : f32 to vector<16x128xf32>
    %93 = arith.mulf %91, %92 : vector<16x128xf32>
    %cst_57 = arith.constant -7.812500e+00 : f32
    %94 = vector.broadcast %cst_57 : f32 to vector<16x128xf32>
    %95 = arith.subf %93, %94 : vector<16x128xf32>
    %96 = math.tanh %95 : vector<16x128xf32>
    %cst_58 = arith.constant dense<0.000000e+00> : vector<128xf32>
    %97 = vector.multi_reduction <add>, %96, %cst_58 [0] : vector<16x128xf32> to vector<128xf32>
    %98 = vector.shape_cast %97 : vector<128xf32> to vector<1x128xf32>
    %c0_59 = arith.constant 0 : index
    %c0_60 = arith.constant 0 : index
    %99 = vector.load %arg2[%c0_59, %c0_60] : memref<16x128xf32, #tpu.memory_space<vmem>>, vector<16x128xf32>
    %cst_61 = arith.constant 2.500000e+01 : f32
    %100 = vector.broadcast %cst_61 : f32 to vector<16x128xf32>
    %101 = arith.mulf %99, %100 : vector<16x128xf32>
    %cst_62 = arith.constant -6.250000e+00 : f32
    %102 = vector.broadcast %cst_62 : f32 to vector<16x128xf32>
    %103 = arith.subf %101, %102 : vector<16x128xf32>
    %104 = math.tanh %103 : vector<16x128xf32>
    %cst_63 = arith.constant dense<0.000000e+00> : vector<128xf32>
    %105 = vector.multi_reduction <add>, %104, %cst_63 [0] : vector<16x128xf32> to vector<128xf32>
    %106 = vector.shape_cast %105 : vector<128xf32> to vector<1x128xf32>
    %c0_64 = arith.constant 0 : index
    %c0_65 = arith.constant 0 : index
    %107 = vector.load %arg2[%c0_64, %c0_65] : memref<16x128xf32, #tpu.memory_space<vmem>>, vector<16x128xf32>
    %cst_66 = arith.constant 2.500000e+01 : f32
    %108 = vector.broadcast %cst_66 : f32 to vector<16x128xf32>
    %109 = arith.mulf %107, %108 : vector<16x128xf32>
    %cst_67 = arith.constant -4.687500e+00 : f32
    %110 = vector.broadcast %cst_67 : f32 to vector<16x128xf32>
    %111 = arith.subf %109, %110 : vector<16x128xf32>
    %112 = math.tanh %111 : vector<16x128xf32>
    %cst_68 = arith.constant dense<0.000000e+00> : vector<128xf32>
    %113 = vector.multi_reduction <add>, %112, %cst_68 [0] : vector<16x128xf32> to vector<128xf32>
    %114 = vector.shape_cast %113 : vector<128xf32> to vector<1x128xf32>
    %c0_69 = arith.constant 0 : index
    %c0_70 = arith.constant 0 : index
    %115 = vector.load %arg2[%c0_69, %c0_70] : memref<16x128xf32, #tpu.memory_space<vmem>>, vector<16x128xf32>
    %cst_71 = arith.constant 2.500000e+01 : f32
    %116 = vector.broadcast %cst_71 : f32 to vector<16x128xf32>
    %117 = arith.mulf %115, %116 : vector<16x128xf32>
    %cst_72 = arith.constant -3.125000e+00 : f32
    %118 = vector.broadcast %cst_72 : f32 to vector<16x128xf32>
    %119 = arith.subf %117, %118 : vector<16x128xf32>
    %120 = math.tanh %119 : vector<16x128xf32>
    %cst_73 = arith.constant dense<0.000000e+00> : vector<128xf32>
    %121 = vector.multi_reduction <add>, %120, %cst_73 [0] : vector<16x128xf32> to vector<128xf32>
    %122 = vector.shape_cast %121 : vector<128xf32> to vector<1x128xf32>
    %c0_74 = arith.constant 0 : index
    %c0_75 = arith.constant 0 : index
    %123 = vector.load %arg2[%c0_74, %c0_75] : memref<16x128xf32, #tpu.memory_space<vmem>>, vector<16x128xf32>
    %cst_76 = arith.constant 2.500000e+01 : f32
    %124 = vector.broadcast %cst_76 : f32 to vector<16x128xf32>
    %125 = arith.mulf %123, %124 : vector<16x128xf32>
    %cst_77 = arith.constant -1.562500e+00 : f32
    %126 = vector.broadcast %cst_77 : f32 to vector<16x128xf32>
    %127 = arith.subf %125, %126 : vector<16x128xf32>
    %128 = math.tanh %127 : vector<16x128xf32>
    %cst_78 = arith.constant dense<0.000000e+00> : vector<128xf32>
    %129 = vector.multi_reduction <add>, %128, %cst_78 [0] : vector<16x128xf32> to vector<128xf32>
    %130 = vector.shape_cast %129 : vector<128xf32> to vector<1x128xf32>
    %c0_79 = arith.constant 0 : index
    %c0_80 = arith.constant 0 : index
    %131 = vector.load %arg2[%c0_79, %c0_80] : memref<16x128xf32, #tpu.memory_space<vmem>>, vector<16x128xf32>
    %cst_81 = arith.constant 2.500000e+01 : f32
    %132 = vector.broadcast %cst_81 : f32 to vector<16x128xf32>
    %133 = arith.mulf %131, %132 : vector<16x128xf32>
    %cst_82 = arith.constant 0.000000e+00 : f32
    %134 = vector.broadcast %cst_82 : f32 to vector<16x128xf32>
    %135 = arith.subf %133, %134 : vector<16x128xf32>
    %136 = math.tanh %135 : vector<16x128xf32>
    %cst_83 = arith.constant dense<0.000000e+00> : vector<128xf32>
    %137 = vector.multi_reduction <add>, %136, %cst_83 [0] : vector<16x128xf32> to vector<128xf32>
    %138 = vector.shape_cast %137 : vector<128xf32> to vector<1x128xf32>
    %c0_84 = arith.constant 0 : index
    %c0_85 = arith.constant 0 : index
    %139 = vector.load %arg2[%c0_84, %c0_85] : memref<16x128xf32, #tpu.memory_space<vmem>>, vector<16x128xf32>
    %cst_86 = arith.constant 2.500000e+01 : f32
    %140 = vector.broadcast %cst_86 : f32 to vector<16x128xf32>
    %141 = arith.mulf %139, %140 : vector<16x128xf32>
    %cst_87 = arith.constant 1.562500e+00 : f32
    %142 = vector.broadcast %cst_87 : f32 to vector<16x128xf32>
    %143 = arith.subf %141, %142 : vector<16x128xf32>
    %144 = math.tanh %143 : vector<16x128xf32>
    %cst_88 = arith.constant dense<0.000000e+00> : vector<128xf32>
    %145 = vector.multi_reduction <add>, %144, %cst_88 [0] : vector<16x128xf32> to vector<128xf32>
    %146 = vector.shape_cast %145 : vector<128xf32> to vector<1x128xf32>
    %c0_89 = arith.constant 0 : index
    %c0_90 = arith.constant 0 : index
    %147 = vector.load %arg2[%c0_89, %c0_90] : memref<16x128xf32, #tpu.memory_space<vmem>>, vector<16x128xf32>
    %cst_91 = arith.constant 2.500000e+01 : f32
    %148 = vector.broadcast %cst_91 : f32 to vector<16x128xf32>
    %149 = arith.mulf %147, %148 : vector<16x128xf32>
    %cst_92 = arith.constant 3.125000e+00 : f32
    %150 = vector.broadcast %cst_92 : f32 to vector<16x128xf32>
    %151 = arith.subf %149, %150 : vector<16x128xf32>
    %152 = math.tanh %151 : vector<16x128xf32>
    %cst_93 = arith.constant dense<0.000000e+00> : vector<128xf32>
    %153 = vector.multi_reduction <add>, %152, %cst_93 [0] : vector<16x128xf32> to vector<128xf32>
    %154 = vector.shape_cast %153 : vector<128xf32> to vector<1x128xf32>
    %c0_94 = arith.constant 0 : index
    %c0_95 = arith.constant 0 : index
    %155 = vector.load %arg2[%c0_94, %c0_95] : memref<16x128xf32, #tpu.memory_space<vmem>>, vector<16x128xf32>
    %cst_96 = arith.constant 2.500000e+01 : f32
    %156 = vector.broadcast %cst_96 : f32 to vector<16x128xf32>
    %157 = arith.mulf %155, %156 : vector<16x128xf32>
    %cst_97 = arith.constant 4.687500e+00 : f32
    %158 = vector.broadcast %cst_97 : f32 to vector<16x128xf32>
    %159 = arith.subf %157, %158 : vector<16x128xf32>
    %160 = math.tanh %159 : vector<16x128xf32>
    %cst_98 = arith.constant dense<0.000000e+00> : vector<128xf32>
    %161 = vector.multi_reduction <add>, %160, %cst_98 [0] : vector<16x128xf32> to vector<128xf32>
    %162 = vector.shape_cast %161 : vector<128xf32> to vector<1x128xf32>
    %c0_99 = arith.constant 0 : index
    %c0_100 = arith.constant 0 : index
    %163 = vector.load %arg2[%c0_99, %c0_100] : memref<16x128xf32, #tpu.memory_space<vmem>>, vector<16x128xf32>
    %cst_101 = arith.constant 2.500000e+01 : f32
    %164 = vector.broadcast %cst_101 : f32 to vector<16x128xf32>
    %165 = arith.mulf %163, %164 : vector<16x128xf32>
    %cst_102 = arith.constant 6.250000e+00 : f32
    %166 = vector.broadcast %cst_102 : f32 to vector<16x128xf32>
    %167 = arith.subf %165, %166 : vector<16x128xf32>
    %168 = math.tanh %167 : vector<16x128xf32>
    %cst_103 = arith.constant dense<0.000000e+00> : vector<128xf32>
    %169 = vector.multi_reduction <add>, %168, %cst_103 [0] : vector<16x128xf32> to vector<128xf32>
    %170 = vector.shape_cast %169 : vector<128xf32> to vector<1x128xf32>
    %c0_104 = arith.constant 0 : index
    %c0_105 = arith.constant 0 : index
    %171 = vector.load %arg2[%c0_104, %c0_105] : memref<16x128xf32, #tpu.memory_space<vmem>>, vector<16x128xf32>
    %cst_106 = arith.constant 2.500000e+01 : f32
    %172 = vector.broadcast %cst_106 : f32 to vector<16x128xf32>
    %173 = arith.mulf %171, %172 : vector<16x128xf32>
    %cst_107 = arith.constant 7.812500e+00 : f32
    %174 = vector.broadcast %cst_107 : f32 to vector<16x128xf32>
    %175 = arith.subf %173, %174 : vector<16x128xf32>
    %176 = math.tanh %175 : vector<16x128xf32>
    %cst_108 = arith.constant dense<0.000000e+00> : vector<128xf32>
    %177 = vector.multi_reduction <add>, %176, %cst_108 [0] : vector<16x128xf32> to vector<128xf32>
    %178 = vector.shape_cast %177 : vector<128xf32> to vector<1x128xf32>
    %c0_109 = arith.constant 0 : index
    %c0_110 = arith.constant 0 : index
    %179 = vector.load %arg2[%c0_109, %c0_110] : memref<16x128xf32, #tpu.memory_space<vmem>>, vector<16x128xf32>
    %cst_111 = arith.constant 2.500000e+01 : f32
    %180 = vector.broadcast %cst_111 : f32 to vector<16x128xf32>
    %181 = arith.mulf %179, %180 : vector<16x128xf32>
    %cst_112 = arith.constant 9.375000e+00 : f32
    %182 = vector.broadcast %cst_112 : f32 to vector<16x128xf32>
    %183 = arith.subf %181, %182 : vector<16x128xf32>
    %184 = math.tanh %183 : vector<16x128xf32>
    %cst_113 = arith.constant dense<0.000000e+00> : vector<128xf32>
    %185 = vector.multi_reduction <add>, %184, %cst_113 [0] : vector<16x128xf32> to vector<128xf32>
    %186 = vector.shape_cast %185 : vector<128xf32> to vector<1x128xf32>
    %c0_114 = arith.constant 0 : index
    %c0_115 = arith.constant 0 : index
    %187 = vector.load %arg2[%c0_114, %c0_115] : memref<16x128xf32, #tpu.memory_space<vmem>>, vector<16x128xf32>
    %cst_116 = arith.constant 2.500000e+01 : f32
    %188 = vector.broadcast %cst_116 : f32 to vector<16x128xf32>
    %189 = arith.mulf %187, %188 : vector<16x128xf32>
    %cst_117 = arith.constant 1.093750e+01 : f32
    %190 = vector.broadcast %cst_117 : f32 to vector<16x128xf32>
    %191 = arith.subf %189, %190 : vector<16x128xf32>
    %192 = math.tanh %191 : vector<16x128xf32>
    %cst_118 = arith.constant dense<0.000000e+00> : vector<128xf32>
    %193 = vector.multi_reduction <add>, %192, %cst_118 [0] : vector<16x128xf32> to vector<128xf32>
    %194 = vector.shape_cast %193 : vector<128xf32> to vector<1x128xf32>
    %c0_119 = arith.constant 0 : index
    %c0_120 = arith.constant 0 : index
    %195 = vector.load %arg2[%c0_119, %c0_120] : memref<16x128xf32, #tpu.memory_space<vmem>>, vector<16x128xf32>
    %cst_121 = arith.constant 2.500000e+01 : f32
    %196 = vector.broadcast %cst_121 : f32 to vector<16x128xf32>
    %197 = arith.mulf %195, %196 : vector<16x128xf32>
    %cst_122 = arith.constant 1.250000e+01 : f32
    %198 = vector.broadcast %cst_122 : f32 to vector<16x128xf32>
    %199 = arith.subf %197, %198 : vector<16x128xf32>
    %200 = math.tanh %199 : vector<16x128xf32>
    %cst_123 = arith.constant dense<0.000000e+00> : vector<128xf32>
    %201 = vector.multi_reduction <add>, %200, %cst_123 [0] : vector<16x128xf32> to vector<128xf32>
    %202 = vector.shape_cast %201 : vector<128xf32> to vector<1x128xf32>
    %c0_124 = arith.constant 0 : index
    %c0_125 = arith.constant 0 : index
    %203 = vector.load %arg2[%c0_124, %c0_125] : memref<16x128xf32, #tpu.memory_space<vmem>>, vector<16x128xf32>
    %cst_126 = arith.constant 2.500000e+01 : f32
    %204 = vector.broadcast %cst_126 : f32 to vector<16x128xf32>
    %205 = arith.mulf %203, %204 : vector<16x128xf32>
    %cst_127 = arith.constant 1.406250e+01 : f32
    %206 = vector.broadcast %cst_127 : f32 to vector<16x128xf32>
    %207 = arith.subf %205, %206 : vector<16x128xf32>
    %208 = math.tanh %207 : vector<16x128xf32>
    %cst_128 = arith.constant dense<0.000000e+00> : vector<128xf32>
    %209 = vector.multi_reduction <add>, %208, %cst_128 [0] : vector<16x128xf32> to vector<128xf32>
    %210 = vector.shape_cast %209 : vector<128xf32> to vector<1x128xf32>
    %c0_129 = arith.constant 0 : index
    %c0_130 = arith.constant 0 : index
    %211 = vector.load %arg2[%c0_129, %c0_130] : memref<16x128xf32, #tpu.memory_space<vmem>>, vector<16x128xf32>
    %cst_131 = arith.constant 2.500000e+01 : f32
    %212 = vector.broadcast %cst_131 : f32 to vector<16x128xf32>
    %213 = arith.mulf %211, %212 : vector<16x128xf32>
    %cst_132 = arith.constant 1.562500e+01 : f32
    %214 = vector.broadcast %cst_132 : f32 to vector<16x128xf32>
    %215 = arith.subf %213, %214 : vector<16x128xf32>
    %216 = math.tanh %215 : vector<16x128xf32>
    %cst_133 = arith.constant dense<0.000000e+00> : vector<128xf32>
    %217 = vector.multi_reduction <add>, %216, %cst_133 [0] : vector<16x128xf32> to vector<128xf32>
    %218 = vector.shape_cast %217 : vector<128xf32> to vector<1x128xf32>
    %c0_134 = arith.constant 0 : index
    %c0_135 = arith.constant 0 : index
    %219 = vector.load %arg2[%c0_134, %c0_135] : memref<16x128xf32, #tpu.memory_space<vmem>>, vector<16x128xf32>
    %cst_136 = arith.constant 2.500000e+01 : f32
    %220 = vector.broadcast %cst_136 : f32 to vector<16x128xf32>
    %221 = arith.mulf %219, %220 : vector<16x128xf32>
    %cst_137 = arith.constant 1.718750e+01 : f32
    %222 = vector.broadcast %cst_137 : f32 to vector<16x128xf32>
    %223 = arith.subf %221, %222 : vector<16x128xf32>
    %224 = math.tanh %223 : vector<16x128xf32>
    %cst_138 = arith.constant dense<0.000000e+00> : vector<128xf32>
    %225 = vector.multi_reduction <add>, %224, %cst_138 [0] : vector<16x128xf32> to vector<128xf32>
    %226 = vector.shape_cast %225 : vector<128xf32> to vector<1x128xf32>
    %c0_139 = arith.constant 0 : index
    %c0_140 = arith.constant 0 : index
    %227 = vector.load %arg2[%c0_139, %c0_140] : memref<16x128xf32, #tpu.memory_space<vmem>>, vector<16x128xf32>
    %cst_141 = arith.constant 2.500000e+01 : f32
    %228 = vector.broadcast %cst_141 : f32 to vector<16x128xf32>
    %229 = arith.mulf %227, %228 : vector<16x128xf32>
    %cst_142 = arith.constant 1.875000e+01 : f32
    %230 = vector.broadcast %cst_142 : f32 to vector<16x128xf32>
    %231 = arith.subf %229, %230 : vector<16x128xf32>
    %232 = math.tanh %231 : vector<16x128xf32>
    %cst_143 = arith.constant dense<0.000000e+00> : vector<128xf32>
    %233 = vector.multi_reduction <add>, %232, %cst_143 [0] : vector<16x128xf32> to vector<128xf32>
    %234 = vector.shape_cast %233 : vector<128xf32> to vector<1x128xf32>
    %c0_144 = arith.constant 0 : index
    %c0_145 = arith.constant 0 : index
    %235 = vector.load %arg2[%c0_144, %c0_145] : memref<16x128xf32, #tpu.memory_space<vmem>>, vector<16x128xf32>
    %cst_146 = arith.constant 2.500000e+01 : f32
    %236 = vector.broadcast %cst_146 : f32 to vector<16x128xf32>
    %237 = arith.mulf %235, %236 : vector<16x128xf32>
    %cst_147 = arith.constant 2.031250e+01 : f32
    %238 = vector.broadcast %cst_147 : f32 to vector<16x128xf32>
    %239 = arith.subf %237, %238 : vector<16x128xf32>
    %240 = math.tanh %239 : vector<16x128xf32>
    %cst_148 = arith.constant dense<0.000000e+00> : vector<128xf32>
    %241 = vector.multi_reduction <add>, %240, %cst_148 [0] : vector<16x128xf32> to vector<128xf32>
    %242 = vector.shape_cast %241 : vector<128xf32> to vector<1x128xf32>
    %c0_149 = arith.constant 0 : index
    %c0_150 = arith.constant 0 : index
    %243 = vector.load %arg2[%c0_149, %c0_150] : memref<16x128xf32, #tpu.memory_space<vmem>>, vector<16x128xf32>
    %cst_151 = arith.constant 2.500000e+01 : f32
    %244 = vector.broadcast %cst_151 : f32 to vector<16x128xf32>
    %245 = arith.mulf %243, %244 : vector<16x128xf32>
    %cst_152 = arith.constant 2.187500e+01 : f32
    %246 = vector.broadcast %cst_152 : f32 to vector<16x128xf32>
    %247 = arith.subf %245, %246 : vector<16x128xf32>
    %248 = math.tanh %247 : vector<16x128xf32>
    %cst_153 = arith.constant dense<0.000000e+00> : vector<128xf32>
    %249 = vector.multi_reduction <add>, %248, %cst_153 [0] : vector<16x128xf32> to vector<128xf32>
    %250 = vector.shape_cast %249 : vector<128xf32> to vector<1x128xf32>
    %c0_154 = arith.constant 0 : index
    %c0_155 = arith.constant 0 : index
    %251 = vector.load %arg2[%c0_154, %c0_155] : memref<16x128xf32, #tpu.memory_space<vmem>>, vector<16x128xf32>
    %cst_156 = arith.constant 2.500000e+01 : f32
    %252 = vector.broadcast %cst_156 : f32 to vector<16x128xf32>
    %253 = arith.mulf %251, %252 : vector<16x128xf32>
    %cst_157 = arith.constant 2.343750e+01 : f32
    %254 = vector.broadcast %cst_157 : f32 to vector<16x128xf32>
    %255 = arith.subf %253, %254 : vector<16x128xf32>
    %256 = math.tanh %255 : vector<16x128xf32>
    %cst_158 = arith.constant dense<0.000000e+00> : vector<128xf32>
    %257 = vector.multi_reduction <add>, %256, %cst_158 [0] : vector<16x128xf32> to vector<128xf32>
    %258 = vector.shape_cast %257 : vector<128xf32> to vector<1x128xf32>
    %c0_159 = arith.constant 0 : index
    %c0_160 = arith.constant 0 : index
    %259 = vector.load %arg2[%c0_159, %c0_160] : memref<16x128xf32, #tpu.memory_space<vmem>>, vector<16x128xf32>
    %cst_161 = arith.constant 2.500000e+01 : f32
    %260 = vector.broadcast %cst_161 : f32 to vector<16x128xf32>
    %261 = arith.mulf %259, %260 : vector<16x128xf32>
    %cst_162 = arith.constant 2.500000e+01 : f32
    %262 = vector.broadcast %cst_162 : f32 to vector<16x128xf32>
    %263 = arith.subf %261, %262 : vector<16x128xf32>
    %264 = math.tanh %263 : vector<16x128xf32>
    %cst_163 = arith.constant dense<0.000000e+00> : vector<128xf32>
    %265 = vector.multi_reduction <add>, %264, %cst_163 [0] : vector<16x128xf32> to vector<128xf32>
    %266 = vector.shape_cast %265 : vector<128xf32> to vector<1x128xf32>
    %cst_164 = arith.constant 0.000000e+00 : f32
    %267 = vector.broadcast %cst_164 : f32 to vector<7x128xf32>
    %c0_165 = arith.constant 0 : index
    %c0_166 = arith.constant 0 : index
    %268 = vector.load %arg4[%c0_165, %c0_166] : memref<40x128xf32, #tpu.memory_space<vmem>>, vector<40x128xf32>
    %269 = tpu.concatenate %10, %18, %26, %34, %42, %50, %58, %66, %74, %82, %90, %98, %106, %114, %122, %130 in 0 : vector<1x128xf32>, vector<1x128xf32>, vector<1x128xf32>, vector<1x128xf32>, vector<1x128xf32>, vector<1x128xf32>, vector<1x128xf32>, vector<1x128xf32>, vector<1x128xf32>, vector<1x128xf32>, vector<1x128xf32>, vector<1x128xf32>, vector<1x128xf32>, vector<1x128xf32>, vector<1x128xf32>, vector<1x128xf32> -> vector<16x128xf32>
    %270 = tpu.concatenate %138, %146, %154, %162, %170, %178, %186, %194, %202, %210, %218, %226, %234, %242, %250, %258 in 0 : vector<1x128xf32>, vector<1x128xf32>, vector<1x128xf32>, vector<1x128xf32>, vector<1x128xf32>, vector<1x128xf32>, vector<1x128xf32>, vector<1x128xf32>, vector<1x128xf32>, vector<1x128xf32>, vector<1x128xf32>, vector<1x128xf32>, vector<1x128xf32>, vector<1x128xf32>, vector<1x128xf32>, vector<1x128xf32> -> vector<16x128xf32>
    %271 = tpu.concatenate %266, %267 in 0 : vector<1x128xf32>, vector<7x128xf32> -> vector<8x128xf32>
    %272 = tpu.concatenate %269, %270, %271 in 0 : vector<16x128xf32>, vector<16x128xf32>, vector<8x128xf32> -> vector<40x128xf32>
    %273 = arith.addf %268, %272 : vector<40x128xf32>
    %c0_167 = arith.constant 0 : index
    %c0_168 = arith.constant 0 : index
    %274 = vector.load %arg4[%c0_167, %c0_168] : memref<40x128xf32, #tpu.memory_space<vmem>>, vector<40x128xf32>
    tpu.vector_store %arg4[%c0_167, %c0_168], %273 {strides = array<i32>} : memref<40x128xf32, #tpu.memory_space<vmem>>, vector<40x128xf32>,
    %c0_i32_169 = arith.constant 0 : i32
    %275 = arith.cmpi eq, %arg1, %c0_i32_169 : i32
    %276 = arith.extui %275 : i1 to i32
    %c0_i32_170 = arith.constant 0 : i32
    %277 = arith.cmpi ne, %276, %c0_i32_170 : i32
    scf.if %277 {
      %c0_171 = arith.constant 0 : index
      %c0_172 = arith.constant 0 : index
      %278 = vector.load %arg4[%c0_171, %c0_172] : memref<40x128xf32, #tpu.memory_space<vmem>>, vector<40x128xf32>
      %279 = vector.extract_strided_slice %278 {offsets = [0, 0], sizes = [32, 128], strides = [1, 1]} : vector<40x128xf32> to vector<32x128xf32>
      %280 = vector.extract_strided_slice %278 {offsets = [1, 0], sizes = [32, 128], strides = [1, 1]} : vector<40x128xf32> to vector<32x128xf32>
      %281 = arith.subf %279, %280 : vector<32x128xf32>
      %cst_173 = arith.constant dense<0.000000e+00> : vector<32xf32>
      %282 = vector.multi_reduction <add>, %281, %cst_173 [1] : vector<32x128xf32> to vector<32xf32>
      %283 = vector.shape_cast %282 : vector<32xf32> to vector<32x1xf32>
      %cst_174 = arith.constant 5.000000e-01 : f32
      %284 = vector.broadcast %cst_174 : f32 to vector<32x1xf32>
      %285 = arith.mulf %284, %283 : vector<32x1xf32>
      %c0_175 = arith.constant 0 : index
      %c0_176 = arith.constant 0 : index
      %286 = vector.load %arg3[%c0_175, %c0_176] : memref<32x1xf32, #tpu.memory_space<vmem>>, vector<32x1xf32>
      tpu.vector_store %arg3[%c0_175, %c0_176], %285 {strides = array<i32>} : memref<32x1xf32, #tpu.memory_space<vmem>>, vector<32x1xf32>,
    } else {
    }
    return
  }
  func.func @transform_0(%arg0: i32, %arg1: i32) -> (i32, i32) {
    %c1_i32 = arith.constant 1 : i32
    %0 = arith.muli %arg0, %c1_i32 : i32
    %1 = arith.addi %0, %arg1 : i32
    %c0_i32 = arith.constant 0 : i32
    %c0_i32_0 = arith.constant 0 : i32
    return %1, %c0_i32 : i32, i32
  }
  func.func @transform_1(%arg0: i32, %arg1: i32) -> (i32, i32) {
    %c0_i32 = arith.constant 0 : i32
    %c0_i32_0 = arith.constant 0 : i32
    return %arg0, %c0_i32 : i32, i32
  }
}

</mosaic_0001>

<bundles_post_ra>
// kernel: tpu_custom_call.1
= control target key start
LH: loop header
LB: loop body
LE: loop exit
PB: predicated region body
PF: predicated region fallthrough
CT: control target
= control target key end

     0   :  { %6 = vsyncpa [#allocation4], 0  ;;  %s726_s6 = smov [#allocation3]   ;;  %s930_s0 = inlined_call_operand.hbm [shape: f32[16,128], index: 0, kind: input, shape index: {}]   ;;  %s931_s1 = inlined_call_operand.vmem [shape: f32[32,1], index: 1, kind: output, shape index: {}]  }
   0x1   :  { %s16_s7 = sshll.u32 %s726_s6, 4  ;;  %s17_s7 = int_to_ptr.vmem [resolvable:$true] %s16_s7 }
   0x2   :  { %s712_s8 = scalar_lea.vmem %s17_s7, 256  ;;  %p717_p1 = scmp.lt.s32.totalorder %s17_s7, %s17_s7 }
   0x3   :  { %p713_p0 = scmp.ne.s32.totalorder %s17_s7, %s712_s8  ;;  %p718_p2 = scmp.lt.s32.totalorder %s712_s8, %s712_s8 }
   0x5   :  { %p719_p3 = por %p718_p2, %p717_p1 }
   0x7   :  { %p720_p4 = pnand %p719_p3, %p713_p0 }
   0x9   :  { %723 = shalt.err (!%p720_p4)
}
   0xa   :  { %s727_s9 = smov 128   ;;  %s728_s10 = smov 8  }
   0xb   :  { %22 = dma.hbm_to_vmem [thread:$0]  %s930_s0, 256, %s17_s7, [#allocation4], %s727_s9, %s727_s9, %s728_s10  }
   0xc   :  { %724 = dma.done.wait [#allocation4], 256  }
   0xd   :  { %725 = vsyncadd [#allocation4], 4294967040  ;;  %v37_v0 = vld [vmem:[#allocation3] sm:$0xff]  ;;  %v38_v1 = vld [vmem:[#allocation3 + $0x8] sm:$0xff]  ;;  %vm407_vm0 = vcmask 1040384   ;;  %vm409_vm1 = vcmask 1041408  }
   0xe   :  { %v742_v2 = vmul.f32 25.0, %v37_v0  ;;  %v744_v3 = vmul.f32 25.0, %v38_v1  ;;  %vm411_vm2 = vcmask 1042432   ;;  %vm413_vm3 = vcmask 1043456  }
   0xf   :  { %vm415_vm4 = vcmask 1044480   ;;  %vm417_vm5 = vcmask 1045504   ;;  %vm419_vm6 = vcmask 1046528   ;;  %vm495_vm7 = vcmask 7168  }
  0x10   :  { %572 = vtanh.f32 %v742_v2  ;;  %v537_v4 = vadd.f32 -1.5625, %v742_v2  ;;  %v538_v5 = vadd.f32 -1.5625, %v744_v3  ;;  %v539_v6 = vadd.f32 -3.125, %v742_v2 }
  0x11   :  { %574 = vtanh.f32 %v744_v3  ;;  %v540_v7 = vadd.f32 -3.125, %v744_v3  ;;  %v541_v8 = vadd.f32 -4.6875, %v742_v2  ;;  %v542_v9 = vadd.f32 -4.6875, %v744_v3 }
  0x12   :  { %576 = vtanh.f32 %v537_v4  ;;  %v543_v10 = vadd.f32 -6.25, %v742_v2  ;;  %v544_v11 = vadd.f32 -6.25, %v744_v3  ;;  %v545_v12 = vadd.f32 -7.8125, %v742_v2 }
  0x13   :  { %578 = vtanh.f32 %v538_v5  ;;  %v546_v13 = vadd.f32 -7.8125, %v744_v3  ;;  %v547_v14 = vadd.f32 -9.375, %v742_v2  ;;  %v548_v15 = vadd.f32 -9.375, %v744_v3 }
  0x14   :  { %580 = vtanh.f32 %v539_v6  ;;  %v549_v16 = vadd.f32 -10.9375, %v742_v2  ;;  %v550_v17 = vadd.f32 -10.9375, %v744_v3  ;;  %v551_v18 = vadd.f32 -12.5, %v742_v2 }
  0x15   :  { %582 = vtanh.f32 %v540_v7  ;;  %v552_v20 = vadd.f32 -12.5, %v744_v3  ;;  %v553_v22 = vadd.f32 -14.0625, %v742_v2  ;;  %v554_v25 = vadd.f32 -14.0625, %v744_v3 }
  0x16   :  { %584 = vtanh.f32 %v541_v8  ;;  %v555_v27 = vadd.f32 -15.625, %v742_v2  ;;  %v556_v32 = vadd.f32 -15.625, %v744_v3  ;;  %v557_v36 = vadd.f32 -17.1875, %v742_v2 }
  0x17   :  { %586 = vtanh.f32 %v542_v9  ;;  %v558_v38 = vadd.f32 -17.1875, %v744_v3  ;;  %v559_v39 = vadd.f32 -18.75, %v742_v2  ;;  %v560_v40 = vadd.f32 -18.75, %v744_v3 }
  0x18   :  { %588 = vtanh.f32 %v543_v10  ;;  %v561_v44 = vadd.f32 -20.3125, %v742_v2  ;;  %v774_v45 = vadd.f32 -20.3125, %v744_v3  ;;  %v777_v48 = vadd.f32 -21.875, %v742_v2 }
  0x19   :  { %590 = vtanh.f32 %v544_v11  ;;  %v780_v49 = vadd.f32 -21.875, %v744_v3  ;;  %v783_v53 = vadd.f32 -23.4375, %v742_v2  ;;  %v786_v54 = vadd.f32 -23.4375, %v744_v3 }
  0x1a   :  { %592 = vtanh.f32 %v545_v12  ;;  %v789_v58 = vadd.f32 25.0, %v742_v2  ;;  %v792_v60 = vadd.f32 25.0, %v744_v3  ;;  %v795_v61 = vadd.f32 23.4375, %v742_v2 }
  0x1b   :  { %594 = vtanh.f32 %v546_v13  ;;  %v798_v62 = vadd.f32 23.4375, %v744_v3  ;;  %v801_v63 = vadd.f32 21.875, %v742_v2  ;;  %v804_v9 = vadd.f32 21.875, %v744_v3 }
  0x1c   :  { %596 = vtanh.f32 %v547_v14  ;;  %v807_v10 = vadd.f32 20.3125, %v742_v2 }
  0x1d   :  { %v573_v19 = vpop.eup %572  ;;  %598 = vtanh.f32 %v548_v15 }
  0x1e   :  { %v575_v21 = vpop.eup %574  ;;  %600 = vtanh.f32 %v549_v16 }
  0x1f   :  { %v577_v23 = vpop.eup %576  ;;  %v219_v24 = vadd.f32 %v575_v21, %v573_v19  ;;  %602 = vtanh.f32 %v550_v17  ;;  %v810_v17 = vadd.f32 20.3125, %v744_v3  ;;  %v816_v19 = vadd.f32 18.75, %v744_v3 }
  0x20   :  { %v579_v26 = vpop.eup %578  ;;  %604 = vtanh.f32 %v551_v18  ;;  %v813_v18 = vadd.f32 18.75, %v742_v2 }
  0x21   :  { %v581_v28 = vpop.eup %580  ;;  %v230_v29 = vadd.f32 %v579_v26, %v577_v23  ;;  %606 = vtanh.f32 %v552_v20  ;;  %v220_v31 = vrot.slane %v219_v24, 4 }
  0x22   :  { %v583_v30 = vpop.eup %582  ;;  %608 = vtanh.f32 %v553_v22 }
  0x23   :  { %v585_v33 = vpop.eup %584  ;;  %v231_v34 = vrot.slane %v230_v29, 4  ;;  %v241_v35 = vadd.f32 %v583_v30, %v581_v28  ;;  %610 = vtanh.f32 %v554_v25  ;;  %v221_v47 = vadd.f32 %v220_v31, %v219_v24 }
  0x24   :  { %v587_v37 = vpop.eup %586  ;;  %612 = vtanh.f32 %v555_v27  ;;  %v819_v27 = vadd.f32 17.1875, %v742_v2  ;;  %v822_v28 = vadd.f32 17.1875, %v744_v3 }
  0x25   :  { %v589_v41 = vpop.eup %588  ;;  %v242_v42 = vrot.slane %v241_v35, 4  ;;  %v252_v43 = vadd.f32 %v587_v37, %v585_v33  ;;  %614 = vtanh.f32 %v556_v32  ;;  %v232_v51 = vadd.f32 %v231_v34, %v230_v29 }
  0x26   :  { %v591_v46 = vpop.eup %590  ;;  %616 = vtanh.f32 %v557_v36  ;;  %v222_v1 = vrot.slane %v221_v47, 2  ;;  %v825_v37 = vadd.f32 15.625, %v742_v2 }
  0x27   :  { %v593_v50 = vpop.eup %592  ;;  %v243_v52 = vadd.f32 %v242_v42, %v241_v35  ;;  %v253_v56 = vrot.slane %v252_v43, 4  ;;  %v263_v57 = vadd.f32 %v591_v46, %v589_v41  ;;  %618 = vtanh.f32 %v558_v38 }
  0x28   :  { %v595_v55 = vpop.eup %594  ;;  %v233_v7 = vrot.slane %v232_v51, 2  ;;  %620 = vtanh.f32 %v559_v39  ;;  %v223_v21 = vadd.f32 %v222_v1, %v221_v47 }
  0x29   :  { %v597_v59 = vpop.eup %596  ;;  %v264_v4 = vrot.slane %v263_v57, 4  ;;  %v274_v5 = vadd.f32 %v595_v55, %v593_v50  ;;  %v244_v8 = vrot.slane %v243_v52, 2  ;;  %v254_v12 = vadd.f32 %v253_v56, %v252_v43 }
  0x2a   :  { %v599_v0 = vpop.eup %598  ;;  %622 = vtanh.f32 %v560_v40  ;;  %v234_v30 = vadd.f32 %v233_v7, %v232_v51  ;;  %v224_v38 = vrot.slane %v223_v21, 1 }
  0x2b   :  { %v601_v6 = vpop.eup %600  ;;  %v275_v13 = vrot.slane %v274_v5, 4  ;;  %v285_v14 = vadd.f32 %v599_v0, %v597_v59  ;;  %v265_v16 = vadd.f32 %v264_v4, %v263_v57  ;;  %v245_v31 = vadd.f32 %v244_v8, %v243_v52 }
  0x2c   :  { %v603_v11 = vpop.eup %602  ;;  %v255_v32 = vrot.slane %v254_v12, 2  ;;  %624 = vtanh.f32 %v561_v44  ;;  %v235_v44 = vrot.slane %v234_v30, 1 }
  0x2d   :  { %v605_v15 = vpop.eup %604  ;;  %v276_v22 = vadd.f32 %v275_v13, %v274_v5  ;;  %v296_v23 = vadd.f32 %v603_v11, %v601_v6  ;;  %v286_v25 = vrot.slane %v285_v14, 4  ;;  %v266_v34 = vrot.slane %v265_v16, 2 }
  0x2e   :  { %v607_v20 = vpop.eup %606  ;;  %626 = vtanh.f32 %v774_v45  ;;  %v246_v47 = vrot.slane %v245_v31, 1  ;;  %v256_v50 = vadd.f32 %v255_v32, %v254_v12  ;;  %v225_v6 = vadd.f32 %v224_v38, %v223_v21 }
  0x2f   :  { %v609_v24 = vpop.eup %608  ;;  %v307_v26 = vadd.f32 %v607_v20, %v605_v15  ;;  %v277_v39 = vrot.slane %v276_v22, 2  ;;  %v297_v40 = vrot.slane %v296_v23, 4  ;;  %v287_v42 = vadd.f32 %v286_v25, %v285_v14 }
  0x30   :  { %v611_v29 = vpop.eup %610  ;;  %628 = vtanh.f32 %v777_v48  ;;  %v267_v55 = vadd.f32 %v266_v34, %v265_v16  ;;  %v236_v7 = vadd.f32 %v235_v44, %v234_v30  ;;  %v247_v13 = vadd.f32 %v246_v47, %v245_v31 }
  0x31   :  { %v613_v33 = vpop.eup %612  ;;  %v308_v35 = vrot.slane %v307_v26, 4  ;;  %v318_v36 = vadd.f32 %v611_v29, %v609_v24  ;;  %630 = vtanh.f32 %v780_v49  ;;  %v278_v59 = vadd.f32 %v277_v39, %v276_v22 }
  0x32   :  { %v615_v41 = vpop.eup %614  ;;  %v298_v45 = vadd.f32 %v297_v40, %v296_v23  ;;  %632 = vtanh.f32 %v783_v53  ;;  %v288_v4 = vrot.slane %v287_v42, 2  ;;  %v257_v49 = vrot.slane %v256_v50, 1 }
  0x33   :  { %v309_v43 = vadd.f32 %v308_v35, %v307_v26  ;;  %v319_v46 = vrot.slane %v318_v36, 4  ;;  %v329_v51 = vadd.f32 %v615_v41, %v613_v33  ;;  %v617_v52 = vpop.eup %616  ;;  %634 = vtanh.f32 %v786_v54 }
  0x34   :  { %v619_v1 = vpop.eup %618  ;;  %v268_v16 = vrot.slane %v267_v55, 1  ;;  %v299_v20 = vrot.slane %v298_v45, 2  ;;  %v279_v24 = vrot.slane %v278_v59, 1  ;;  %v289_v25 = vadd.f32 %v288_v4, %v287_v42 }
  0x35   :  { %v310_v56 = vrot.slane %v309_v43, 2  ;;  %v320_v57 = vadd.f32 %v319_v46, %v318_v36  ;;  %v330_v0 = vrot.slane %v329_v51, 4  ;;  %v340_v11 = vadd.f32 %v619_v1, %v617_v52  ;;  %v621_v12 = vpop.eup %620 }
  0x36   :  { %636 = vtanh.f32 %v789_v58  ;;  %v428_v33 = vsel %vm407_vm0, %v225_v6, %v236_v7  ;;  %v837_v38 = vadd.f32 15.625, %v744_v3  ;;  %v258_v39 = vadd.f32 %v257_v49, %v256_v50 }
  0x37   :  { %v311_v5 = vadd.f32 %v310_v56, %v309_v43  ;;  %v321_v48 = vrot.slane %v320_v57, 2  ;;  %v331_v8 = vadd.f32 %v330_v0, %v329_v51  ;;  %v341_v53 = vrot.slane %v340_v11, 4  ;;  %v623_v23 = vpop.eup %622 }
  0x38   :  { %v351_v29 = vadd.f32 %v623_v23, %v621_v12  ;;  %638 = vtanh.f32 %v792_v60  ;;  %v269_v40 = vadd.f32 %v268_v16, %v267_v55  ;;  %v300_v41 = vadd.f32 %v299_v20, %v298_v45 }
  0x39   :  { %v312_v14 = vrot.slane %v311_v5, 1  ;;  %v322_v15 = vadd.f32 %v321_v48, %v320_v57  ;;  %v332_v22 = vrot.slane %v331_v8, 2  ;;  %v342_v21 = vadd.f32 %v341_v53, %v340_v11  ;;  %v625_v30 = vpop.eup %624 }
  0x3a   :  { %640 = vtanh.f32 %v795_v61  ;;  %v352_v36 = vrot.slane %v351_v29, 4  ;;  %v429_v44 = vsel %vm409_vm1, %v428_v33, %v247_v13  ;;  %v280_v61 = vadd.f32 %v279_v24, %v278_v59 }
  0x3b   :  { %v323_v26 = vrot.slane %v322_v15, 1  ;;  %v333_v54 = vadd.f32 %v332_v22, %v331_v8  ;;  %v313_v31 = vadd.f32 %v312_v14, %v311_v5  ;;  %v343_v35 = vrot.slane %v342_v21, 2  ;;  %v627_v58 = vpop.eup %626 }
  0x3c   :  { %642 = vtanh.f32 %v798_v62  ;;  %v353_v43 = vadd.f32 %v352_v36, %v351_v29  ;;  %v362_v46 = vadd.f32 %v627_v58, %v625_v30  ;;  %v290_v47 = vrot.slane %v289_v25, 1 }
  0x3d   :  { %v324_v32 = vadd.f32 %v323_v26, %v322_v15  ;;  %v334_v34 = vrot.slane %v333_v54, 1  ;;  %v629_v60 = vpop.eup %628  ;;  %v344_v42 = vadd.f32 %v343_v35, %v342_v21  ;;  %644 = vtanh.f32 %v801_v63 }
  0x3e   :  { %v631_v56 = vpop.eup %630  ;;  %v354_v0 = vrot.slane %v353_v43, 2  ;;  %v363_v50 = vrot.slane %v362_v46, 4  ;;  %v301_v62 = vrot.slane %v300_v41, 1  ;;  %v430_v1 = vsel %vm411_vm2, %v429_v44, %v258_v39 }
  0x3f   :  { %v335_v51 = vadd.f32 %v334_v34, %v333_v54  ;;  %v435_v52 = vsel %vm407_vm0, %v313_v31, %v324_v32  ;;  %v345_v57 = vrot.slane %v344_v42, 1  ;;  %v633_v55 = vpop.eup %632  ;;  %v373_v45 = vadd.f32 %v631_v56, %v629_v60 }
  0x40   :  { %646 = vtanh.f32 %v804_v9  ;;  %v635_v4 = vpop.eup %634  ;;  %v355_v5 = vadd.f32 %v354_v0, %v353_v43  ;;  %v364_v48 = vadd.f32 %v363_v50, %v362_v46  ;;  %v431_v12 = vsel %vm413_vm3, %v430_v1, %v269_v40 }
  0x41   :  { %v346_v59 = vadd.f32 %v345_v57, %v344_v42  ;;  %648 = vtanh.f32 %v807_v10  ;;  %v374_v6 = vrot.slane %v373_v45, 4  ;;  %v384_v7 = vadd.f32 %v635_v4, %v633_v55 }
  0x42   :  { %v436_v8 = vsel %vm409_vm1, %v435_v52, %v335_v51  ;;  %650 = vtanh.f32 %v810_v17  ;;  %v356_v63 = vrot.slane %v355_v5, 1  ;;  %v365_v11 = vrot.slane %v364_v48, 2 }
  0x43   :  { %652 = vtanh.f32 %v813_v18  ;;  %v291_v9 = vadd.f32 %v290_v47, %v289_v25  ;;  %v375_v13 = vadd.f32 %v374_v6, %v373_v45  ;;  %v385_v49 = vrot.slane %v384_v7, 4  ;;  %v637_v14 = vpop.eup %636 }
  0x44   :  { %654 = vtanh.f32 %v816_v19  ;;  %v357_v15 = vadd.f32 %v356_v63, %v355_v5  ;;  %v366_v10 = vadd.f32 %v365_v11, %v364_v48  ;;  %v437_v16 = vsel %vm411_vm2, %v436_v8, %v346_v59 }
  0x45   :  { %656 = vtanh.f32 %v819_v27  ;;  %v639_v20 = vpop.eup %638  ;;  %v376_v17 = vrot.slane %v375_v13, 2  ;;  %v386_v22 = vadd.f32 %v385_v49, %v384_v7  ;;  %v432_v53 = vsel %vm415_vm4, %v431_v12, %v280_v61 }
  0x46   :  { %658 = vtanh.f32 %v822_v28  ;;  %v367_v23 = vrot.slane %v366_v10, 1  ;;  %v519_v24 = vadd.f32 14.0625, %v742_v2  ;;  %v520_v19 = vadd.f32 14.0625, %v744_v3 }
  0x47   :  { %v641_v18 = vpop.eup %640  ;;  %v521_v25 = vadd.f32 12.5, %v742_v2  ;;  %v302_v26 = vadd.f32 %v301_v62, %v300_v41  ;;  %v377_v54 = vadd.f32 %v376_v17, %v375_v13  ;;  %v387_v21 = vrot.slane %v386_v22, 2 }
  0x48   :  { %v438_v27 = vsel %vm413_vm3, %v437_v16, %v357_v15  ;;  %v368_v30 = vadd.f32 %v367_v23, %v366_v10  ;;  %v433_v31 = vsel %vm417_vm5, %v432_v53, %v291_v9  ;;  %v45_v32 = vadd.f32 %v639_v20, %v637_v14 }
  0x49   :  { %v643_v29 = vpop.eup %642  ;;  %660 = vtanh.f32 %v825_v37  ;;  %v378_v28 = vrot.slane %v377_v54, 1  ;;  %v388_v33 = vadd.f32 %v387_v21, %v386_v22  ;;  %v522_v36 = vadd.f32 12.5, %v744_v3 }
  0x4a   :  { %v56_v34 = vadd.f32 %v643_v29, %v641_v18  ;;  %662 = vtanh.f32 %v837_v38  ;;  %v439_v35 = vsel %vm415_vm4, %v438_v27, %v368_v30  ;;  %v645_v58 = vpop.eup %644  ;;  %v865_v41 = vsel %vm419_vm6, %v433_v31, %v302_v26 }
  0x4b   :  { %664 = vtanh.f32 %v519_v24  ;;  %v379_v39 = vadd.f32 %v378_v28, %v377_v54  ;;  %v389_v40 = vrot.slane %v388_v33, 1  ;;  %v46_v42 = vrot.slane %v45_v32, 4 }
  0x4c   :  { %666 = vtanh.f32 %v520_v19  ;;  %v523_v37 = vadd.f32 10.9375, %v742_v2  ;;  %v57_v44 = vrot.slane %v56_v34, 4  ;;  %v469_v47 = vrot.slane %v865_v41, 1 }
  0x4d   :  { %v647_v60 = vpop.eup %646  ;;  %668 = vtanh.f32 %v521_v25  ;;  %v390_v46 = vadd.f32 %v389_v40, %v388_v33  ;;  %v440_v38 = vsel %vm417_vm5, %v439_v35, %v379_v39  ;;  %v524_v52 = vadd.f32 10.9375, %v744_v3 }
  0x4e   :  { %v649_v43 = vpop.eup %648  ;;  %v67_v51 = vadd.f32 %v647_v60, %v645_v58  ;;  %670 = vtanh.f32 %v522_v36  ;;  %v525_v50 = vadd.f32 9.375, %v742_v2  ;;  %v47_v45 = vadd.f32 %v46_v42, %v45_v32 }
  0x4f   :  { %v651_v61 = vpop.eup %650  ;;  %v872_v57 = vsel %vm419_vm6, %v440_v38, %v390_v46  ;;  %672 = vtanh.f32 %v523_v37  ;;  %v58_v59 = vadd.f32 %v57_v44, %v56_v34  ;;  %v526_v7 = vadd.f32 9.375, %v744_v3 }
  0x50   :  { %v653_v56 = vpop.eup %652  ;;  %v78_v0 = vadd.f32 %v651_v61, %v649_v43  ;;  %v471_v62 = vrot.slane %v872_v57, 1  ;;  %v68_v1 = vrot.slane %v67_v51, 4  ;;  %674 = vtanh.f32 %v524_v52 }
  0x51   :  { %v655_v55 = vpop.eup %654  ;;  %v527_v12 = vadd.f32 7.8125, %v742_v2  ;;  %v48_v9 = vrot.slane %v47_v45, 2  ;;  %676 = vtanh.f32 %v525_v50  ;;  %v528_v49 = vadd.f32 7.8125, %v744_v3 }
  0x52   :  { %v657_v4 = vpop.eup %656  ;;  %v89_v5 = vadd.f32 %v655_v55, %v653_v56  ;;  %v472_v6 = vsel %vm419_vm6, %v469_v47, %v471_v62  ;;  %v69_v63 = vadd.f32 %v68_v1, %v67_v51  ;;  %v79_v11 = vrot.slane %v78_v0, 4 }
  0x53   :  { %v659_v48 = vpop.eup %658  ;;  %v481_v8 = vsub.f32 %v865_v41, %v472_v6  ;;  %v59_v15 = vrot.slane %v58_v59, 2  ;;  %v529_v16 = vadd.f32 6.25, %v742_v2  ;;  %678 = vtanh.f32 %v526_v7 }
  0x54   :  { %v90_v13 = vrot.slane %v89_v5, 4  ;;  %v100_v10 = vadd.f32 %v659_v48, %v657_v4  ;;  %v530_v17 = vadd.f32 6.25, %v744_v3  ;;  %v531_v22 = vadd.f32 4.6875, %v742_v2 }
  0x55   :  { %487 = vadd.xlane.f32.xlu1 %v481_v8  ;;  %v70_v18 = vrot.slane %v69_v63, 2  ;;  %v80_v23 = vadd.f32 %v79_v11, %v78_v0  ;;  %680 = vtanh.f32 %v527_v12  ;;  %v532_v24 = vadd.f32 4.6875, %v744_v3 }
  0x56   :  { %v661_v14 = vpop.eup %660  ;;  %v49_v25 = vadd.f32 %v48_v9, %v47_v45  ;;  %v91_v26 = vadd.f32 %v90_v13, %v89_v5  ;;  %682 = vtanh.f32 %v528_v49  ;;  %v533_v54 = vadd.f32 3.125, %v742_v2 }
  0x57   :  { %v663_v20 = vpop.eup %662  ;;  %v60_v27 = vadd.f32 %v59_v15, %v58_v59  ;;  %v101_v29 = vrot.slane %v100_v10, 4  ;;  %684 = vtanh.f32 %v529_v16  ;;  %v534_v31 = vadd.f32 3.125, %v744_v3 }
  0x58   :  { %v665_v53 = vpop.eup %664  ;;  %v111_v30 = vadd.f32 %v663_v20, %v661_v14  ;;  %686 = vtanh.f32 %v530_v17  ;;  %v535_v32 = vadd.f32 1.5625, %v742_v2  ;;  %v536_v28 = vadd.f32 1.5625, %v744_v3 }
  0x59   :  { %v667_v19 = vpop.eup %666  ;;  %v71_v34 = vadd.f32 %v70_v18, %v69_v63  ;;  %v81_v35 = vrot.slane %v80_v23, 2  ;;  %688 = vtanh.f32 %v531_v22  ;;  %v50_v58 = vrot.slane %v49_v25, 1 }
  0x5a   :  { %v669_v21 = vpop.eup %668  ;;  %v122_v36 = vadd.f32 %v667_v19, %v665_v53  ;;  %v92_v39 = vrot.slane %v91_v26, 2  ;;  %690 = vtanh.f32 %v532_v24  ;;  %v61_v42 = vrot.slane %v60_v27, 1 }
  0x5b   :  { %v671_v33 = vpop.eup %670  ;;  %v102_v37 = vadd.f32 %v101_v29, %v100_v10  ;;  %v112_v43 = vrot.slane %v111_v30, 4  ;;  %692 = vtanh.f32 %v533_v54  ;;  %v567_v38 = vadd.f32 -25.0, %v742_v2 }
  0x5c   :  { %v133_v40 = vadd.f32 %v671_v33, %v669_v21  ;;  %v673_v60 = vpop.eup %672  ;;  %694 = vtanh.f32 %v534_v31  ;;  %v568_v44 = vadd.f32 -25.0, %v744_v3  ;;  %v72_v51 = vrot.slane %v71_v34, 1 }
  0x5d   :  { %v675_v61 = vpop.eup %674  ;;  %v82_v52 = vadd.f32 %v81_v35, %v80_v23  ;;  %v123_v56 = vrot.slane %v122_v36, 4  ;;  %696 = vtanh.f32 %v535_v32  ;;  %v51_v0 = vadd.f32 %v50_v58, %v49_v25 }
  0x5e   :  { %v134_v46 = vrot.slane %v133_v40, 4  ;;  %v93_v50 = vadd.f32 %v92_v39, %v91_v26  ;;  %v144_v45 = vadd.f32 %v675_v61, %v673_v60  ;;  %v677_v1 = vpop.eup %676  ;;  %v62_v4 = vadd.f32 %v61_v42, %v60_v27 }
  0x5f   :  { %v103_v59 = vrot.slane %v102_v37, 2  ;;  %v113_v5 = vadd.f32 %v112_v43, %v111_v30  ;;  %698 = vtanh.f32 %v536_v28  ;;  %v73_v2 = vadd.f32 %v72_v51, %v71_v34 }
  0x60   :  { %v135_v55 = vadd.f32 %v134_v46, %v133_v40  ;;  %v145_v6 = vrot.slane %v144_v45, 4  ;;  %v679_v7 = vpop.eup %678  ;;  %v83_v8 = vrot.slane %v82_v52, 1  ;;  %v124_v3 = vadd.f32 %v123_v56, %v122_v36 }
  0x61   :  { %700 = vtanh.f32 %v567_v38  ;;  %v94_v11 = vrot.slane %v93_v50, 1  ;;  %v155_v13 = vadd.f32 %v679_v7, %v677_v1  ;;  %v104_v14 = vadd.f32 %v103_v59, %v102_v37 }
  0x62   :  { %v136_v48 = vrot.slane %v135_v55, 2  ;;  %v681_v63 = vpop.eup %680  ;;  %v146_v9 = vadd.f32 %v145_v6, %v144_v45  ;;  %v114_v15 = vrot.slane %v113_v5, 2  ;;  %v408_v10 = vsel %vm407_vm0, %v51_v0, %v62_v4 }
  0x63   :  { %v683_v49 = vpop.eup %682  ;;  %702 = vtanh.f32 %v568_v44  ;;  %v156_v17 = vrot.slane %v155_v13, 4  ;;  %v84_v18 = vadd.f32 %v83_v8, %v82_v52  ;;  %v125_v23 = vrot.slane %v124_v3, 2 }
  0x64   :  { %v137_v12 = vadd.f32 %v136_v48, %v135_v55  ;;  %v685_v16 = vpop.eup %684  ;;  %v147_v20 = vrot.slane %v146_v9, 2  ;;  %v166_v22 = vadd.f32 %v683_v49, %v681_v63  ;;  %v410_v21 = vsel %vm409_vm1, %v408_v10, %v73_v2 }
  0x65   :  { %v687_v53 = vpop.eup %686  ;;  %v157_v26 = vadd.f32 %v156_v17, %v155_v13  ;;  %v95_v29 = vadd.f32 %v94_v11, %v93_v50  ;;  %v105_v30 = vrot.slane %v104_v14, 1  ;;  %v115_v31 = vadd.f32 %v114_v15, %v113_v5 }
  0x66   :  { %v138_v24 = vrot.slane %v137_v12, 1  ;;  %v689_v19 = vpop.eup %688  ;;  %v148_v25 = vadd.f32 %v147_v20, %v146_v9  ;;  %v167_v54 = vrot.slane %v166_v22, 4  ;;  %v177_v32 = vadd.f32 %v687_v53, %v685_v16 }
  0x67   :  { %v691_v27 = vpop.eup %690  ;;  %v158_v34 = vrot.slane %v157_v26, 2  ;;  %v126_v39 = vadd.f32 %v125_v23, %v124_v3  ;;  %v412_v42 = vsel %vm411_vm2, %v410_v21, %v84_v18  ;;  %v106_v61 = vadd.f32 %v105_v30, %v104_v14 }
  0x68   :  { %v693_v28 = vpop.eup %692  ;;  %v149_v33 = vrot.slane %v148_v25, 1  ;;  %v168_v35 = vadd.f32 %v167_v54, %v166_v22  ;;  %v188_v36 = vadd.f32 %v691_v27, %v689_v19  ;;  %v139_v40 = vadd.f32 %v138_v24, %v137_v12 }
  0x69   :  { %v695_v58 = vpop.eup %694  ;;  %v178_v60 = vrot.slane %v177_v32, 4  ;;  %v159_v46 = vadd.f32 %v158_v34, %v157_v26  ;;  %v116_v51 = vrot.slane %v115_v31, 1  ;;  %v414_v1 = vsel %vm413_vm3, %v412_v42, %v95_v29 }
  0x6a   :  { %v697_v37 = vpop.eup %696  ;;  %v150_v43 = vadd.f32 %v149_v33, %v148_v25  ;;  %v169_v38 = vrot.slane %v168_v35, 2  ;;  %v189_v44 = vrot.slane %v188_v36, 4  ;;  %v199_v56 = vadd.f32 %v695_v58, %v693_v28 }
  0x6b   :  { %v179_v52 = vadd.f32 %v178_v60, %v177_v32  ;;  %v160_v50 = vrot.slane %v159_v46, 1  ;;  %v127_v7 = vrot.slane %v126_v39, 1  ;;  %v117_v63 = vadd.f32 %v116_v51, %v115_v31 }
  0x6c   :  { %v699_v0 = vpop.eup %698  ;;  %v170_v55 = vadd.f32 %v169_v38, %v168_v35  ;;  %v190_v45 = vadd.f32 %v189_v44, %v188_v36  ;;  %v200_v59 = vrot.slane %v199_v56, 4  ;;  %v421_v48 = vsel %vm407_vm0, %v139_v40, %v150_v43 }
  0x6d   :  { %v180_v4 = vrot.slane %v179_v52, 2  ;;  %v210_v5 = vadd.f32 %v699_v0, %v697_v37  ;;  %v161_v2 = vadd.f32 %v160_v50, %v159_v46  ;;  %v416_v15 = vsel %vm415_vm4, %v414_v1, %v106_v61 }
  0x6e   :  { %v701_v6 = vpop.eup %700  ;;  %v171_v8 = vrot.slane %v170_v55, 1  ;;  %v191_v3 = vrot.slane %v190_v45, 2  ;;  %v201_v12 = vadd.f32 %v200_v59, %v199_v56  ;;  %v128_v53 = vadd.f32 %v127_v7, %v126_v39 }
  0x6f   :  { %v181_v11 = vadd.f32 %v180_v4, %v179_v52  ;;  %v211_v9 = vrot.slane %v210_v5, 4  ;;  %v422_v10 = vsel %vm409_vm1, %v421_v48, %v161_v2  ;;  %v418_v21 = vsel %vm417_vm5, %v416_v15, %v117_v63 }
  0x70   :  { %v703_v13 = vpop.eup %702  ;;  %v172_v49 = vadd.f32 %v171_v8, %v170_v55  ;;  %v192_v14 = vadd.f32 %v191_v3, %v190_v45  ;;  %v202_v20 = vrot.slane %v201_v12, 2  ;;  %v420_v34 = vsel %vm419_vm6, %v418_v21, %v128_v53 }
  0x71   :  { %v182_v16 = vrot.slane %v181_v11, 1  ;;  %v212_v17 = vadd.f32 %v211_v9, %v210_v5  ;;  %v395_v22 = vadd.f32 %v703_v13, %v701_v6  ;;  %v466_v40 = vrot.slane %v420_v34, 1 }
  0x72   :  { %v193_v18 = vrot.slane %v192_v14, 1  ;;  %v423_v23 = vsel %vm411_vm2, %v422_v10, %v172_v49  ;;  %v203_v19 = vadd.f32 %v202_v20, %v201_v12 }
  0x73   :  { %v183_v24 = vadd.f32 %v182_v16, %v181_v11  ;;  %v213_v25 = vrot.slane %v212_v17, 2  ;;  %v396_v26 = vrot.slane %v395_v22, 4 }
  0x74   :  { %v194_v54 = vadd.f32 %v193_v18, %v192_v14  ;;  %v204_v27 = vrot.slane %v203_v19, 1 }
  0x75   :  { %v214_v29 = vadd.f32 %v213_v25, %v212_v17  ;;  %v424_v30 = vsel %vm413_vm3, %v423_v23, %v183_v24  ;;  %v397_v31 = vadd.f32 %v396_v26, %v395_v22 }
  0x76   :  { %v425_v32 = vsel %vm415_vm4, %v424_v30, %v194_v54  ;;  %v205_v28 = vadd.f32 %v204_v27, %v203_v19 }
  0x77   :  { %v215_v33 = vrot.slane %v214_v29, 1  ;;  %v398_v35 = vrot.slane %v397_v31, 2 }
  0x78   :  { %v426_v58 = vsel %vm417_vm5, %v425_v32, %v205_v28 }
  0x79   :  { %v216_v36 = vadd.f32 %v215_v33, %v214_v29  ;;  %v399_v39 = vadd.f32 %v398_v35, %v397_v31 }
  0x7b   :  { %v427_v60 = vsel %vm419_vm6, %v426_v58, %v216_v36  ;;  %v400_v42 = vrot.slane %v399_v39, 1 }
  0x7c   :  { %v467_v37 = vrot.slane %v427_v60, 1 }
  0x7d   :  { %v401_v43 = vadd.f32 %v400_v42, %v399_v39 }
  0x7e   :  { %v468_v46 = vsel %vm419_vm6, %v466_v40, %v467_v37  ;;  %v470_v38 = vsel %vm419_vm6, %v467_v37, %v469_v47 }
  0x7f   :  { %v479_v44 = vsub.f32 %v420_v34, %v468_v46  ;;  %v442_v61 = vsel %vm407_vm0, %v401_v43, 0.0  ;;  %v480_v52 = vsub.f32 %v427_v60, %v470_v38 }
  0x80   :  { %v473_v51 = vrot.slane %v442_v61, 1 }
  0x81   :  { %483 = vadd.xlane.f32.xlu0 %v479_v44 }
  0x82   :  { %v474_v56 = vsel %vm419_vm6, %v471_v62, %v473_v51 }
  0x83   :  { %v482_v0 = vsub.f32 %v872_v57, %v474_v56 }
  0x85   :  { %489 = vadd.xlane.f32.xlu1 %v482_v0  ;;  %485 = vadd.xlane.f32.xlu0 %v480_v52 }
  0xde   :  { %v488_v50 = vpop.xlane.xlu1 %487 }
  0xdf   :  { %v493_v55 = vmul.f32 0.5, %v488_v50 }
  0xe1   :  { %498 = vst.msk [vmem:[%s931_s1 + $0x10] sm:$0xff] %vm495_vm7, %v493_v55 }
 0x10a   :  { %v484_v41 = vpop.xlane.xlu0 %483 }
 0x10b   :  { %v491_v47 = vmul.f32 0.5, %v484_v41 }
 0x10d   :  { %496 = vst.msk [vmem:[%s931_s1] sm:$0xff] %vm495_vm7, %v491_v47 }
 0x10e   :  { %v490_v45 = vpop.xlane.xlu1 %489  ;;  %v486_v1 = vpop.xlane.xlu0 %485 }
 0x10f   :  { %v494_v62 = vmul.f32 0.5, %v490_v45  ;;  %v492_v4 = vmul.f32 0.5, %v486_v1 }
 0x111   :  { %499 = vst.msk [vmem:[%s931_s1 + $0x18] sm:$0xff] %vm495_vm7, %v494_v62  ;;  %497 = vst.msk [vmem:[%s931_s1 + $0x8] sm:$0xff] %vm495_vm7, %v492_v4 }
 0x112   :  { %504 = vsyncpa [#allocation4], 1 }

</bundles_post_ra>
